<compile_context>
chip_gen: v7x
topology: tpu7x:2x2x1
jax: 0.10.0
libtpu: 0.0.40
codegen_flags: <defaults>
</compile_context>

<pallas_src>
import numpy as np
import jax
import jax.numpy as jnp
from jax.experimental import pallas as pl
from jax.experimental.pallas import tpu as pltpu

# ----------------------------- TCRD config (PyTorch defaults) ---------------
AA_NUM = 24
FEATURE_NUM = 15
KERNEL_SIZES = (2, 3, 4, 5, 6, 7)
FILTER_NUM = (3, 3, 3, 2, 2, 1)                  # filters_num = 1
N_FILT = sum(FILTER_NUM)                         # 14
N_CLASSES = 2

C_PAD = 16                                       # in-channels 15 -> 16
NF_PAD = 16                                      # conv filters 14 -> 16
K_IN = AA_NUM * C_PAD                            # 384: flattened (pos, chan)
N_CONV = AA_NUM * NF_PAD                         # 384: flattened (pos, filt)
OUT_PAD = 128                                    # lane-dense logits (2 valid)
TB_MAX = 256                                     # batch rows per grid step
NEG_BIAS = -1.0e9                                # kills invalid columns at ReLU


# ----------------------------- Pallas kernel --------------------------------
def _tcrd_kernel(x_ref, w_ref, b_ref, wfc_ref, bfc_ref, o_ref):
    # x_ref  : (tb, 384)   bf16  samples, channels-last (24 pos x 16 ch), flat
    # w_ref  : (384, 384)  bf16  block-Toeplitz conv weight, all branches fused
    # b_ref  : (1, 384)    f32   conv bias (+NEG_BIAS at invalid columns)
    # wfc_ref: (128, 128)  bf16  fc weight (rows 0..13 valid)
    # bfc_ref: (1, 128)    f32   fc bias
    # o_ref  : (tb, 128)   bf16  logits (lanes 0..1 valid)

    # Fused multi-branch Conv1d: one lane-dense bf16 matmul, f32 accumulation.
    y = jnp.dot(x_ref[...], w_ref[...], preferred_element_type=jnp.float32)
    # bias + ReLU; invalid (pos, filter) columns become exactly 0 via NEG_BIAS.
    y = jnp.maximum(y + b_ref[...], 0.0)                     # (tb, 384) f32

    # AdaptiveMaxPool1d(1): max over 24 positions.  Column c = t*16 + f, so
    # the three 128-lane chunks hold t in {0..7}, {8..15}, {16..23}; combine
    # them, then reduce the 8 remaining 16-lane groups with a roll max-tree.
    m = jnp.maximum(jnp.maximum(y[:, 0:128], y[:, 128:256]), y[:, 256:384])
    m = jnp.maximum(m, pltpu.roll(m, 64, 1))
    m = jnp.maximum(m, pltpu.roll(m, 32, 1))
    m = jnp.maximum(m, pltpu.roll(m, 16, 1))                  # lane l: feat[l%16]

    # Linear(14, 2): only rows 0..13 of wfc are nonzero, so each feature is
    # counted exactly once even though lanes repeat every 16.
    logits = jnp.dot(m.astype(jnp.bfloat16), wfc_ref[...],
                     preferred_element_type=jnp.float32) + bfc_ref[...]
    o_ref[...] = logits.astype(o_ref.dtype)


# ----------------------------- parameters -----------------------------------
def init_params(key):
    """Deterministic init mimicking PyTorch default uniform(-1/sqrt(fan_in))."""
    params = {"conv_w": [], "conv_b": []}
    for h, oc in zip(KERNEL_SIZES, FILTER_NUM):
        key, k1, k2 = jax.random.split(key, 3)
        bound = 1.0 / np.sqrt(FEATURE_NUM * h)
        params["conv_w"].append(
            jax.random.uniform(k1, (oc, FEATURE_NUM, h), jnp.float32, -bound, bound))
        params["conv_b"].append(
            jax.random.uniform(k2, (oc,), jnp.float32, -bound, bound))
    key, k1, k2 = jax.random.split(key, 3)
    bound = 1.0 / np.sqrt(N_FILT)
    params["fc_w"] = jax.random.uniform(
        k1, (N_CLASSES, N_FILT), jnp.float32, -bound, bound)
    params["fc_b"] = jax.random.uniform(
        k2, (N_CLASSES,), jnp.float32, -bound, bound)
    return params


def _pack_params(params):
    """Pack the 6 conv branches into one block-Toeplitz weight + bias + fc."""
    w_t = np.zeros((K_IN, N_CONV), np.float32)        # rows: s*16+ch, cols: t*16+f
    b_all = np.full((1, N_CONV), NEG_BIAS, np.float32)
    col = 0
    for i, h in enumerate(KERNEL_SIZES):
        oc = FILTER_NUM[i]
        w = np.asarray(params["conv_w"][i])            # (oc, 15, h)
        b = np.asarray(params["conv_b"][i])            # (oc,)
        L = AA_NUM - h + 1                             # valid output positions
        for t in range(L):
            for k in range(h):
                s = t + k                              # input position (< 24)
                w_t[s * C_PAD:s * C_PAD + FEATURE_NUM,
                    t * NF_PAD + col:t * NF_PAD + col + oc] = w[:, :, k].T
            b_all[0, t * NF_PAD + col:t * NF_PAD + col + oc] = b
        col += oc
    w_fc = np.zeros((OUT_PAD, OUT_PAD), np.float32)
    w_fc[:N_FILT, :N_CLASSES] = np.asarray(params["fc_w"]).T
    b_fc = np.zeros((1, OUT_PAD), np.float32)
    b_fc[0, :N_CLASSES] = np.asarray(params["fc_b"])
    return (jnp.asarray(w_t, jnp.bfloat16), jnp.asarray(b_all),
            jnp.asarray(w_fc, jnp.bfloat16), jnp.asarray(b_fc))


def _choose_tb(batch):
    """Rows per grid step: aim for >= 4 grid steps (v7x dual-TC balance),
    multiple of 16 (bf16 sublane packing), capped at TB_MAX."""
    tb = -(-batch // 4)
    tb = max(16, -(-tb // 16) * 16)
    return min(TB_MAX, tb)


# ----------------------------- forward (Pallas) ------------------------------
def tcrd_forward(x, params):
    x = x.reshape(-1, FEATURE_NUM, AA_NUM).astype(jnp.float32)
    B = x.shape[0]
    tb = _choose_tb(B)
    B_pad = tb * (-(-B // tb))

    # Channels-last, zero-pad channels 15->16 and batch, flatten to lane-dense
    # (B_pad, 384) and ship bf16 (the MXU's native LHS dtype).
    x = jnp.transpose(x, (0, 2, 1))                                  # (B, 24, 15)
    x = jnp.pad(x, ((0, B_pad - B), (0, 0), (0, C_PAD - FEATURE_NUM)))
    x = x.reshape(B_pad, K_IN).astype(jnp.bfloat16)                  # (B_pad, 384)

    w_t, b_all, w_fc, b_fc = _pack_params(params)

    out = pl.pallas_call(
        _tcrd_kernel,
        out_shape=jax.ShapeDtypeStruct((B_pad, OUT_PAD), jnp.bfloat16),
        grid_spec=pltpu.PrefetchScalarGridSpec(
            num_scalar_prefetch=0,
            grid=(B_pad // tb,),
            in_specs=[
                pl.BlockSpec((tb, K_IN), lambda i: (i, 0)),
                pl.BlockSpec((K_IN, N_CONV), lambda i: (0, 0)),
                pl.BlockSpec((1, N_CONV), lambda i: (0, 0)),
                pl.BlockSpec((OUT_PAD, OUT_PAD), lambda i: (0, 0)),
                pl.BlockSpec((1, OUT_PAD), lambda i: (0, 0)),
            ],
            out_specs=pl.BlockSpec((tb, OUT_PAD), lambda i: (i, 0)),
        ),
        compiler_params=pltpu.CompilerParams(
            dimension_semantics=("parallel",)),
    )(x, w_t, b_all, w_fc, b_fc)
    # TODO(synk): nn.Dropout(p=0.4) is identity at inference (eval mode);
    # training-mode stochastic dropout is not implemented.
    # NOTE: x / weights / logits travel in bf16 (f32 accumulation), so results
    # differ from the f32 PyTorch reference at the ~1e-2 level (inference-OK).
    return out[:B, :N_CLASSES].astype(jnp.float32)


# ----------------------------- pure-JAX reference ----------------------------
def tcrd_reference(x, params):
    x = x.reshape(-1, FEATURE_NUM, AA_NUM).astype(jnp.float32)
    B = x.shape[0]
    feats = []
    for i, h in enumerate(KERNEL_SIZES):
        W = params["conv_w"][i]           # (oc, 15, h)
        b = params["conv_b"][i]           # (oc,)
        oc = FILTER_NUM[i]
        L = AA_NUM - h + 1
        cols = []
        for t in range(L):
            patch = x[:, :, t:t + h].reshape(B, FEATURE_NUM * h)
            cols.append(patch @ W.reshape(oc, FEATURE_NUM * h).T + b)
        conv = jnp.maximum(jnp.stack(cols, axis=-1), 0.0)   # (B, oc, L)
        feats.append(jnp.max(conv, axis=-1))                # AdaptiveMaxPool1d(1)
    feat = jnp.concatenate(feats, axis=1)                   # (B, 14)
    return feat @ params["fc_w"].T + params["fc_b"]


# ----------------------------- main ------------------------------------------
if __name__ == "__main__":
    key = jax.random.PRNGKey(0)
    kp, kx = jax.random.split(key)
    params = init_params(kp)

    B = 4
    x = jax.random.normal(kx, (B, FEATURE_NUM, AA_NUM), dtype=jnp.float32)

    out = jax.block_until_ready(tcrd_forward(x, params))       # (B, 2)
    ref = jax.block_until_ready(tcrd_reference(x, params))

    # bf16 inputs/weights/logits (f32 accumulation) vs full-f32 reference.
    np.testing.assert_allclose(np.asarray(out), np.asarray(ref),
                               rtol=2e-2, atol=2.5e-2)
    print("KERNEL_OK")
</pallas_src>

<mosaic_0001>
module attributes {stable_mosaic.version = 11 : i64} {
  func.func @_tcrd_kernel(%arg0: i32, %arg1: memref<16x384xbf16, #tpu.memory_space<vmem>>, %arg2: memref<384x384xbf16, #tpu.memory_space<vmem>>, %arg3: memref<1x384xf32, #tpu.memory_space<vmem>>, %arg4: memref<128x128xbf16, #tpu.memory_space<vmem>>, %arg5: memref<1x128xf32, #tpu.memory_space<vmem>>, %arg6: memref<16x128xbf16, #tpu.memory_space<vmem>>) attributes {dimension_semantics = [#tpu.dimension_semantics<parallel>], iteration_bounds = array<i64: 1>, scalar_prefetch = 0 : i64, scratch_operands = 0 : i64, tpu.core_type = #tpu.core_type<tc>, window_params = [{transform_indices = @transform_0, window_bounds = array<i64: 16, 384>}, {pipeline_mode = #tpu.pipeline_mode<synchronous>, transform_indices = @transform_1, window_bounds = array<i64: 384, 384>}, {pipeline_mode = #tpu.pipeline_mode<synchronous>, transform_indices = @transform_2, window_bounds = array<i64: 1, 384>}, {pipeline_mode = #tpu.pipeline_mode<synchronous>, transform_indices = @transform_3, window_bounds = array<i64: 128, 128>}, {pipeline_mode = #tpu.pipeline_mode<synchronous>, transform_indices = @transform_4, window_bounds = array<i64: 1, 128>}, {transform_indices = @transform_5, window_bounds = array<i64: 16, 128>}]} {
    %c0 = arith.constant 0 : index
    %c0_0 = arith.constant 0 : index
    %0 = vector.load %arg1[%c0, %c0_0] : memref<16x384xbf16, #tpu.memory_space<vmem>>, vector<16x384xbf16>
    %c0_1 = arith.constant 0 : index
    %c0_2 = arith.constant 0 : index
    %1 = vector.load %arg2[%c0_1, %c0_2] : memref<384x384xbf16, #tpu.memory_space<vmem>>, vector<384x384xbf16>
    %cst = arith.constant dense<0.000000e+00> : vector<16x384xf32>
    %2 = tpu.matmul %0, %1, %cst {dimension_numbers = #tpu.dot_dimension_numbers<[1], [0], [0], [1], [0, 0, 1, 1], [], []>} : vector<16x384xbf16>, vector<384x384xbf16>, vector<16x384xf32> -> vector<16x384xf32>
    %c0_3 = arith.constant 0 : index
    %c0_4 = arith.constant 0 : index
    %3 = vector.load %arg3[%c0_3, %c0_4] : memref<1x384xf32, #tpu.memory_space<vmem>>, vector<1x384xf32>
    %4 = vector.broadcast %3 : vector<1x384xf32> to vector<16x384xf32>
    %5 = arith.addf %2, %4 : vector<16x384xf32>
    %cst_5 = arith.constant 0.000000e+00 : f32
    %6 = vector.broadcast %cst_5 : f32 to vector<16x384xf32>
    %7 = arith.maximumf %5, %6 : vector<16x384xf32>
    %8 = vector.extract_strided_slice %7 {offsets = [0, 0], sizes = [16, 128], strides = [1, 1]} : vector<16x384xf32> to vector<16x128xf32>
    %9 = vector.extract_strided_slice %7 {offsets = [0, 128], sizes = [16, 128], strides = [1, 1]} : vector<16x384xf32> to vector<16x128xf32>
    %10 = arith.maximumf %8, %9 : vector<16x128xf32>
    %11 = vector.extract_strided_slice %7 {offsets = [0, 256], sizes = [16, 128], strides = [1, 1]} : vector<16x384xf32> to vector<16x128xf32>
    %12 = arith.maximumf %10, %11 : vector<16x128xf32>
    %c64_i32 = arith.constant 64 : i32
    %13 = tpu.dynamic_rotate %12 by %c64_i32 dim 1 : vector<16x128xf32>, i32 -> vector<16x128xf32>
    %14 = arith.maximumf %12, %13 : vector<16x128xf32>
    %c32_i32 = arith.constant 32 : i32
    %15 = tpu.dynamic_rotate %14 by %c32_i32 dim 1 : vector<16x128xf32>, i32 -> vector<16x128xf32>
    %16 = arith.maximumf %14, %15 : vector<16x128xf32>
    %c16_i32 = arith.constant 16 : i32
    %17 = tpu.dynamic_rotate %16 by %c16_i32 dim 1 : vector<16x128xf32>, i32 -> vector<16x128xf32>
    %18 = arith.maximumf %16, %17 : vector<16x128xf32>
    %19 = arith.truncf %18 : vector<16x128xf32> to vector<16x128xbf16>
    %c0_6 = arith.constant 0 : index
    %c0_7 = arith.constant 0 : index
    %20 = vector.load %arg4[%c0_6, %c0_7] : memref<128x128xbf16, #tpu.memory_space<vmem>>, vector<128x128xbf16>
    %cst_8 = arith.constant dense<0.000000e+00> : vector<16x128xf32>
    %21 = tpu.matmul %19, %20, %cst_8 {dimension_numbers = #tpu.dot_dimension_numbers<[1], [0], [0], [1], [0, 0, 1, 1], [], []>} : vector<16x128xbf16>, vector<128x128xbf16>, vector<16x128xf32> -> vector<16x128xf32>
    %c0_9 = arith.constant 0 : index
    %c0_10 = arith.constant 0 : index
    %22 = vector.load %arg5[%c0_9, %c0_10] : memref<1x128xf32, #tpu.memory_space<vmem>>, vector<1x128xf32>
    %23 = vector.broadcast %22 : vector<1x128xf32> to vector<16x128xf32>
    %24 = arith.addf %21, %23 : vector<16x128xf32>
    %25 = arith.truncf %24 : vector<16x128xf32> to vector<16x128xbf16>
    %c0_11 = arith.constant 0 : index
    %c0_12 = arith.constant 0 : index
    %26 = vector.load %arg6[%c0_11, %c0_12] : memref<16x128xbf16, #tpu.memory_space<vmem>>, vector<16x128xbf16>
    tpu.vector_store %arg6[%c0_11, %c0_12], %25 {strides = array<i32>} : memref<16x128xbf16, #tpu.memory_space<vmem>>, vector<16x128xbf16>,
    return
  }
  func.func @transform_0(%arg0: i32) -> (i32, i32) {
    %c0_i32 = arith.constant 0 : i32
    %c0_i32_0 = arith.constant 0 : i32
    return %arg0, %c0_i32 : i32, i32
  }
  func.func @transform_1(%arg0: i32) -> (i32, i32) {
    %c0_i32 = arith.constant 0 : i32
    %c0_i32_0 = arith.constant 0 : i32
    %c0_i32_1 = arith.constant 0 : i32
    return %c0_i32, %c0_i32_0 : i32, i32
  }
  func.func @transform_2(%arg0: i32) -> (i32, i32) {
    %c0_i32 = arith.constant 0 : i32
    %c0_i32_0 = arith.constant 0 : i32
    %c0_i32_1 = arith.constant 0 : i32
    return %c0_i32, %c0_i32_0 : i32, i32
  }
  func.func @transform_3(%arg0: i32) -> (i32, i32) {
    %c0_i32 = arith.constant 0 : i32
    %c0_i32_0 = arith.constant 0 : i32
    %c0_i32_1 = arith.constant 0 : i32
    return %c0_i32, %c0_i32_0 : i32, i32
  }
  func.func @transform_4(%arg0: i32) -> (i32, i32) {
    %c0_i32 = arith.constant 0 : i32
    %c0_i32_0 = arith.constant 0 : i32
    %c0_i32_1 = arith.constant 0 : i32
    return %c0_i32, %c0_i32_0 : i32, i32
  }
  func.func @transform_5(%arg0: i32) -> (i32, i32) {
    %c0_i32 = arith.constant 0 : i32
    %c0_i32_0 = arith.constant 0 : i32
    return %arg0, %c0_i32 : i32, i32
  }
}

</mosaic_0001>

<bundles_post_ra>
// kernel: tpu_custom_call.1
= control target key start
LH: loop header
LB: loop body
LE: loop exit
PB: predicated region body
PF: predicated region fallthrough
CT: control target
= control target key end

     0   :  { %10 = vsyncpa [#allocation3], 0  ;;  %s1459_s0 = inlined_call_operand.hbm [shape: bf16[16,384], index: 0, kind: input, shape index: {}]   ;;  %s1460_s1 = inlined_call_operand.hbm [shape: bf16[384,384], index: 1, kind: input, shape index: {}]   ;;  %s1461_s2 = inlined_call_operand.vmem [shape: f32[1,384], index: 2, kind: input, shape index: {}]   ;;  %s1462_s3 = inlined_call_operand.hbm [shape: bf16[128,128], index: 3, kind: input, shape index: {}]   ;;  %s1463_s4 = inlined_call_operand.vmem [shape: f32[1,128], index: 4, kind: input, shape index: {}]   ;;  %s1464_s5 = inlined_call_operand.hbm [shape: bf16[16,128], index: 5, kind: output, shape index: {}]  }
   0x1   :  { %11 = vsyncpa [#allocation6], 0 }
   0x2   :  { %12 = vsyncpa [#allocation4], 0  ;;  %s1328_s18 = smov [#allocation5]   ;;  %s1329_s20 = smov [#allocation2]  }
   0x3   :  { %s30_s19 = sshll.u32 %s1328_s18, 4  ;;  %s18_s21 = sshll.u32 %s1329_s20, 4  ;;  %s31_s19 = int_to_ptr.vmem [resolvable:$true] %s30_s19  ;;  %s1371_s21 = int_to_ptr.vmem [resolvable:$true] %s18_s21 }
   0x4   :  { %s1234_s24 = scalar_lea.hbm %s1460_s1, 9216 }
   0x5   :  { %p1235_p0 = scmp.ne.s32.totalorder %s1460_s1, %s1234_s24  ;;  %p1238_p1 = scmp.lt.u32.totalorder %s1234_s24, %s1460_s1 }
   0x7   :  { %p1240_p2 = pnand %p1238_p1, %p1235_p0 }
   0x9   :  { %1243 = shalt.err (!%p1240_p2)
}
   0xa   :  { %s1244_s29 = scalar_lea.vmem %s31_s19, 9216  ;;  %p1249_p4 = scmp.lt.s32.totalorder %s31_s19, %s31_s19 }
   0xb   :  { %p1245_p3 = scmp.ne.s32.totalorder %s31_s19, %s1244_s29  ;;  %p1250_p5 = scmp.lt.s32.totalorder %s1244_s29, %s1244_s29 }
   0xd   :  { %p1251_p6 = por %p1250_p5, %p1249_p4 }
   0xf   :  { %p1252_p7 = pnand %p1251_p6, %p1245_p3 }
  0x11   :  { %1255 = shalt.err (!%p1252_p7)
}
  0x12   :  { %s1330_s30 = smov 192   ;;  %s1331_s6 = smov 12  }
  0x13   :  { %36 = dma.hbm_to_vmem [thread:$0]  %s1460_s1, 9216, %s31_s19, [#allocation6], %s1330_s30, %s1330_s30, %s1331_s6  }
  0x14   :  { %s1256_s11 = scalar_lea.hbm %s1459_s0, 384 }
  0x15   :  { %p1257_p8 = scmp.ne.s32.totalorder %s1459_s0, %s1256_s11  ;;  %p1260_p9 = scmp.lt.u32.totalorder %s1256_s11, %s1459_s0 }
  0x17   :  { %p1262_p10 = pnand %p1260_p9, %p1257_p8 }
  0x19   :  { %1265 = shalt.err (!%p1262_p10)
}
  0x1a   :  { %s1266_s16 = scalar_lea.vmem %s1371_s21, 384  ;;  %p1271_p12 = scmp.lt.s32.totalorder %s1371_s21, %s1371_s21 }
  0x1b   :  { %p1267_p11 = scmp.ne.s32.totalorder %s1371_s21, %s1266_s16  ;;  %p1272_p13 = scmp.lt.s32.totalorder %s1266_s16, %s1266_s16 }
  0x1d   :  { %p1273_p0 = por %p1272_p13, %p1271_p12 }
  0x1f   :  { %p1274_p1 = pnand %p1273_p0, %p1267_p11 }
  0x21   :  { %1277 = shalt.err (!%p1274_p1)
}
  0x22   :  { %24 = dma.hbm_to_vmem [thread:$0]  %s1459_s0, 384, %s1371_s21, [#allocation3], %s1330_s30, %s1330_s30, %s1331_s6  }
  0x23   :  { %s1332_s18 = smov [#allocation7]   ;;  %s1278_s23 = scalar_lea.hbm %s1462_s3, 1024 }
  0x24   :  { %s44_s19 = sshll.u32 %s1332_s18, 4  ;;  %p1279_p2 = scmp.ne.s32.totalorder %s1462_s3, %s1278_s23  ;;  %s45_s19 = int_to_ptr.vmem [resolvable:$true] %s44_s19 }
  0x25   :  { %p1282_p3 = scmp.lt.u32.totalorder %s1278_s23, %s1462_s3 }
  0x27   :  { %p1284_p4 = pnand %p1282_p3, %p1279_p2 }
  0x29   :  { %1287 = shalt.err (!%p1284_p4)
}
  0x2a   :  { %s1288_s28 = scalar_lea.vmem %s45_s19, 1024  ;;  %p1293_p6 = scmp.lt.s32.totalorder %s45_s19, %s45_s19 }
  0x2b   :  { %p1289_p5 = scmp.ne.s32.totalorder %s45_s19, %s1288_s28  ;;  %p1294_p7 = scmp.lt.s32.totalorder %s1288_s28, %s1288_s28 }
  0x2d   :  { %p1295_p8 = por %p1294_p7, %p1293_p6 }
  0x2f   :  { %p1296_p9 = pnand %p1295_p8, %p1289_p5 }
  0x31   :  { %1299 = shalt.err (!%p1296_p9)
}
  0x32   :  { %s1333_s0 = smov 64   ;;  %s1334_s21 = smov 4  }
  0x33   :  { %50 = dma.hbm_to_vmem [thread:$0]  %s1462_s3, 1024, %s45_s19, [#allocation6], %s1333_s0, %s1333_s0, %s1334_s21  }
  0x34   :  { %1322 = dma.done.wait [#allocation3], 384  }
  0x35   :  { %1323 = vsyncadd [#allocation3], 4294966912 }
  0x36   :  { %1324 = dma.done.wait [#allocation6], 10240  }
  0x37   :  { %1325 = vsyncadd [#allocation6], 4294957056  ;;  %v1126_v0 = vld [vmem:[#allocation5 + $0x4] ss:$12 sps:$4 sm:$0xff]   ;;  %v1128_v1 = vld [vmem:[#allocation5] ss:$12 sps:$4 sm:$0xff]  }
  0x38   :  { %580 = vmatprep.subr.bf16.mxu0 %v1126_v0  ;;  %v1129_v2 = vld [vmem:[#allocation5 + $0x1c] ss:$12 sps:$4 sm:$0xff]   ;;  %v1131_v3 = vld [vmem:[#allocation5 + $0x18] ss:$12 sps:$4 sm:$0xff]   ;;  %v1134_v6 = vld [vmem:[#allocation5 + $0x34] ss:$12 sps:$4 sm:$0xff]  }
  0x39   :  { %581 = vmatpush1.bf16.msra.mxu0 %v1128_v1  ;;  %v1132_v4 = vld [vmem:[#allocation5 + $0xc8] ss:$12 sps:$4 sm:$0xff]   ;;  %v1136_v7 = vld [vmem:[#allocation5 + $0x30] ss:$12 sps:$4 sm:$0xff]   ;;  %v1137_v8 = vld [vmem:[#allocation5 + $0xe0] ss:$12 sps:$4 sm:$0xff]  }
  0x3a   :  { %582 = vmatprep.subr.bf16.mxu0 %v1129_v2  ;;  %v1133_v5 = vld [vmem:[#allocation5 + $0x8] ss:$12 sps:$4 sm:$0xff]   ;;  %1010 = vmatprep.subr.bf16.mxu1 %v1132_v4  ;;  %v1138_v9 = vld [vmem:[#allocation5 + $0x20] ss:$12 sps:$4 sm:$0xff]   ;;  %v1142_v12 = vld [vmem:[#allocation5 + $0xf8] ss:$12 sps:$4 sm:$0xff]  }
  0x3b   :  { %1011 = vmatpush3.bf16.msra.mxu1 %v1133_v5  ;;  %v1139_v10 = vld [vmem:[#allocation5 + $0x4c] ss:$12 sps:$4 sm:$0xff]   ;;  %v1141_v11 = vld [vmem:[#allocation5 + $0x48] ss:$12 sps:$4 sm:$0xff]   ;;  %v1144_v14 = vld [vmem:[#allocation5 + $0x64] ss:$12 sps:$4 sm:$0xff]  }
  0x3c   :  { %1012 = vmatprep.subr.bf16.mxu1 %v1137_v8  ;;  %v1143_v13 = vld [vmem:[#allocation5 + $0x38] ss:$12 sps:$4 sm:$0xff]   ;;  %v1147_v15 = vld [vmem:[#allocation5 + $0x110] ss:$12 sps:$4 sm:$0xff]   ;;  %v1146_v17 = vld [vmem:[#allocation5 + $0x60] ss:$12 sps:$4 sm:$0xff]  }
  0x3d   :  { %583 = vmatpush1.bf16.msra.mxu0 %v1131_v3  ;;  %v1148_v16 = vld [vmem:[#allocation5 + $0x50] ss:$12 sps:$4 sm:$0xff]   ;;  %v1152_v19 = vld [vmem:[#allocation5 + $0x128] ss:$12 sps:$4 sm:$0xff]   ;;  %v1151_v20 = vld [vmem:[#allocation5 + $0x78] ss:$12 sps:$4 sm:$0xff]  }
  0x3e   :  { %584 = vmatprep.subr.bf16.mxu0 %v1134_v6  ;;  %v1149_v18 = vld [vmem:[#allocation5 + $0x7c] ss:$12 sps:$4 sm:$0xff]   ;;  %v1154_v22 = vld [vmem:[#allocation5 + $0x94] ss:$12 sps:$4 sm:$0xff]   ;;  %v1162_v26 = vld [vmem:[#allocation5 + $0x158] ss:$12 sps:$4 sm:$0xff]  }
  0x3f   :  { %1013 = vmatpush3.bf16.msra.mxu1 %v1138_v9  ;;  %v1153_v21 = vld [vmem:[#allocation5 + $0x68] ss:$12 sps:$4 sm:$0xff]   ;;  %v1157_v23 = vld [vmem:[#allocation5 + $0x140] ss:$12 sps:$4 sm:$0xff]   ;;  %v1156_v24 = vld [vmem:[#allocation5 + $0x90] ss:$12 sps:$4 sm:$0xff]  }
  0x40   :  { %1014 = vmatprep.subr.bf16.mxu1 %v1142_v12  ;;  %v1158_v25 = vld [vmem:[#allocation5 + $0x80] ss:$12 sps:$4 sm:$0xff]   ;;  %v1161_v28 = vld [vmem:[#allocation5 + $0xa8] ss:$12 sps:$4 sm:$0xff]   ;;  %v1163_v29 = vld [vmem:[#allocation5 + $0x98] ss:$12 sps:$4 sm:$0xff]  }
  0x41   :  { %585 = vmatpush1.bf16.msra.mxu0 %v1136_v7  ;;  %v1159_v27 = vld [vmem:[#allocation5 + $0xac] ss:$12 sps:$4 sm:$0xff]   ;;  %v1167_v30 = vld [vmem:[#allocation5 + $0x170] ss:$12 sps:$4 sm:$0xff]   ;;  %v1172_v36 = vld [vmem:[#allocation2] ss:$12 sps:$4 sm:$0xff]  }
  0x42   :  { %586 = vmatprep.subr.bf16.mxu0 %v1139_v10  ;;  %v1164_v31 = vld [vmem:[#allocation5 + $0xc4] ss:$12 sps:$4 sm:$0xff]   ;;  %v1174_v33 = vld [vmem:[#allocation2 + $0x4] ss:$12 sps:$4 sm:$0xff]   ;;  %v1169_v35 = vld [vmem:[#allocation5 + $0xdc] ss:$12 sps:$4 sm:$0xff]  }
  0x43   :  { %1015 = vmatpush3.bf16.msra.mxu1 %v1143_v13  ;;  %v1168_v32 = vld [vmem:[#allocation5 + $0xb0] ss:$12 sps:$4 sm:$0xff]   ;;  %v1166_v34 = vld [vmem:[#allocation5 + $0xc0] ss:$12 sps:$4 sm:$0xff]   ;;  %698 = vmatprep.mubr.bf16.mxu1 %v1174_v33  ;;  %v1175_v37 = vld [vmem:[#allocation5 + $0x188] ss:$12 sps:$4 sm:$0xff]  }
  0x44   :  { %1016 = vmatprep.subr.bf16.mxu1 %v1147_v15  ;;  %612 = vmatprep.mubr.bf16.mxu0 %v1174_v33  ;;  %v1171_v38 = vld [vmem:[#allocation5 + $0xd8] ss:$12 sps:$4 sm:$0xff]   ;;  %v1335_v39 = vmov 0.0   ;;  %v1176_v40 = vld [vmem:[#allocation5 + $0xf4] ss:$12 sps:$4 sm:$0xff]   ;;  %vm1336_vm0 = vmmov 0  }
  0x45   :  { %587 = vmatpush1.bf16.msra.mxu0 %v1141_v11  ;;  %v1179_v41 = vld [vmem:[#allocation5 + $0x1a0] ss:$12 sps:$4 sm:$0xff]   ;;  %v1178_v42 = vld [vmem:[#allocation5 + $0xf0] ss:$12 sps:$4 sm:$0xff]   ;;  %v1183_v44 = vld [vmem:[#allocation5 + $0x1b8] ss:$12 sps:$4 sm:$0xff]  }
  0x46   :  { %588 = vmatprep.subr.bf16.mxu0 %v1144_v14  ;;  %v1180_v43 = vld [vmem:[#allocation5 + $0x10c] ss:$12 sps:$4 sm:$0xff]   ;;  %v1182_v45 = vld [vmem:[#allocation5 + $0x108] ss:$12 sps:$4 sm:$0xff]   ;;  %v1184_v46 = vld [vmem:[#allocation5 + $0x124] ss:$12 sps:$4 sm:$0xff]  }
  0x47   :  { %1017 = vmatpush3.bf16.msra.mxu1 %v1148_v16  ;;  %v1187_v47 = vld [vmem:[#allocation5 + $0x1d0] ss:$12 sps:$4 sm:$0xff]   ;;  %v1186_v48 = vld [vmem:[#allocation5 + $0x120] ss:$12 sps:$4 sm:$0xff]   ;;  %v1191_v50 = vld [vmem:[#allocation5 + $0x1e8] ss:$12 sps:$4 sm:$0xff]  }
  0x48   :  { %1018 = vmatprep.subr.bf16.mxu1 %v1152_v19  ;;  %v1188_v49 = vld [vmem:[#allocation5 + $0x13c] ss:$12 sps:$4 sm:$0xff]   ;;  %v1190_v51 = vld [vmem:[#allocation5 + $0x138] ss:$12 sps:$4 sm:$0xff]   ;;  %v1192_v52 = vld [vmem:[#allocation5 + $0x154] ss:$12 sps:$4 sm:$0xff]   ;;  %v165_v19 = vlaneseq }
  0x49   :  { %589 = vmatpush1.bf16.msra.mxu0 %v1146_v17  ;;  %v1195_v53 = vld [vmem:[#allocation5 + $0x200] ss:$12 sps:$4 sm:$0xff]   ;;  %v1194_v54 = vld [vmem:[#allocation5 + $0x150] ss:$12 sps:$4 sm:$0xff]   ;;  %v1198_v56 = vld [vmem:[#allocation5 + $0x168] ss:$12 sps:$4 sm:$0xff]  }
  0x4a   :  { %590 = vmatprep.subr.bf16.mxu0 %v1149_v18  ;;  %v1196_v55 = vld [vmem:[#allocation5 + $0x16c] ss:$12 sps:$4 sm:$0xff]   ;;  %v1202_v58 = vld [vmem:[#allocation5 + $0x184] ss:$12 sps:$4 sm:$0xff]   ;;  %v1206_v61 = vld [vmem:[#allocation5 + $0x19c] ss:$12 sps:$4 sm:$0xff]  }
  0x4b   :  { %1019 = vmatpush3.bf16.msra.mxu1 %v1153_v21  ;;  %v1199_v57 = vld [vmem:[#allocation5 + $0x218] ss:$12 sps:$4 sm:$0xff]   ;;  %v1203_v59 = vld [vmem:[#allocation5 + $0x230] ss:$12 sps:$4 sm:$0xff]   ;;  %v1200_v60 = vld [vmem:[#allocation5 + $0x180] ss:$12 sps:$4 sm:$0xff]  }
  0x4c   :  { %1020 = vmatprep.subr.bf16.mxu1 %v1157_v23  ;;  %v1207_v62 = vld [vmem:[#allocation2 + $0x8] ss:$12 sps:$4 sm:$0xff]   ;;  %v1204_v63 = vld [vmem:[#allocation5 + $0x198] ss:$12 sps:$4 sm:$0xff]   ;;  %v1337_v0 = vmov 0   ;;  %s1339_s7 = smov 16  }
  0x4d   :  { %591 = vmatpush1.bf16.msra.mxu0 %v1151_v20  ;;  %v1210_v1 = vld [vmem:[#allocation5 + $0x1b4] ss:$12 sps:$4 sm:$0xff]   ;;  %v1208_v2 = vld [vmem:[#allocation5 + $0x1b0] ss:$12 sps:$4 sm:$0xff]   ;;  %v1213_v3 = vld [vmem:[#allocation5 + $0x1cc] ss:$12 sps:$4 sm:$0xff]  }
  0x4e   :  { %592 = vmatprep.subr.bf16.mxu0 %v1154_v22  ;;  %v1211_v4 = vld [vmem:[#allocation5 + $0x1c8] ss:$12 sps:$4 sm:$0xff]   ;;  %v1216_v5 = vld [vmem:[#allocation5 + $0x1e4] ss:$12 sps:$4 sm:$0xff]   ;;  %v1214_v6 = vld [vmem:[#allocation5 + $0x1e0] ss:$12 sps:$4 sm:$0xff]  }
  0x4f   :  { %1021 = vmatpush3.bf16.msra.mxu1 %v1158_v25  ;;  %v1219_v7 = vld [vmem:[#allocation5 + $0x1fc] ss:$12 sps:$4 sm:$0xff]   ;;  %v1217_v8 = vld [vmem:[#allocation5 + $0x1f8] ss:$12 sps:$4 sm:$0xff]   ;;  %v1222_v9 = vld [vmem:[#allocation5 + $0x214] ss:$12 sps:$4 sm:$0xff]  }
  0x50   :  { %1022 = vmatprep.subr.bf16.mxu1 %v1162_v26  ;;  %v1220_v10 = vld [vmem:[#allocation5 + $0x210] ss:$12 sps:$4 sm:$0xff]   ;;  %v1225_v11 = vld [vmem:[#allocation5 + $0x22c] ss:$12 sps:$4 sm:$0xff]   ;;  %v1223_v12 = vld [vmem:[#allocation5 + $0x228] ss:$12 sps:$4 sm:$0xff]  }
  0x51   :  { %593 = vmatpush1.bf16.msra.mxu0 %v1156_v24  ;;  %v166_v20 = vshrl.u32 %v165_v19, 7  ;;  %v163_v22 = vld [vmem:[%s1461_s2] sm:$0x7]  ;;  %s1338_s2 = smov 32   ;;  %s1340_s10 = smov [#allocation8]  }
  0x52   :  { %594 = vmatprep.subr.bf16.mxu0 %v1159_v27  ;;  %s904_s11 = sshll.u32 %s1340_s10, 4  ;;  %s905_s11 = int_to_ptr.vmem [resolvable:$true] %s904_s11 }
  0x53   :  { %1023 = vmatpush3.bf16.msra.mxu1 %v1163_v29  ;;  %v175_v21 = vsub.s32 2, %v166_v20  ;;  %v171_v33 = vsub.s32 1, %v166_v20  ;;  %s1300_s12 = scalar_lea.vmem %s905_s11, 128  ;;  %p1305_p11 = scmp.lt.s32.totalorder %s905_s11, %s905_s11 }
  0x54   :  { %1024 = vmatprep.subr.bf16.mxu1 %v1167_v30  ;;  %p1301_p10 = scmp.ne.s32.totalorder %s905_s11, %s1300_s12  ;;  %p1306_p12 = scmp.lt.s32.totalorder %s1300_s12, %s1300_s12 }
  0x55   :  { %595 = vmatpush1.bf16.msra.mxu0 %v1161_v28  ;;  %v176_v23 = vrot.slane %v163_v22, %v175_v21 }
  0x56   :  { %596 = vmatprep.subr.bf16.mxu0 %v1164_v31  ;;  %p1307_p13 = por %p1306_p12, %p1305_p11 }
  0x57   :  { %1025 = vmatpush3.bf16.msra.mxu1 %v1168_v32  ;;  %v167_v32 = vsub.s32 0, %v166_v20 }
  0x58   :  { %1050 = vmatprep.subr.bf16.mxu1 %v1335_v39  ;;  %p1308_p0 = pnand %p1307_p13, %p1301_p10 }
  0x59   :  { %597 = vmatpush1.bf16.msra.mxu0 %v1166_v34  ;;  %v168_v34 = vrot.slane %v163_v22, %v167_v32 }
  0x5a   :  { %598 = vmatprep.subr.bf16.mxu0 %v1169_v35  ;;  %699 = vmatmul.mubr.bf16.vlgmr.msra.gmra.mrb[0].mxu1 %v1172_v36  ;;  %v172_v35 = vrot.slane %v163_v22, %v171_v33 }
  0x5b   :  { %1051 = vmatpush3.bf16.msra.mxu1 %v1175_v37  ;;  %1066 = vmatprep.mubr.msk.bf16.mxu1 %vm1336_vm0, %v1335_v39 }
  0x5c   :  { %1052 = vmatprep.subr.bf16.mxu1 %v1335_v39 }
  0x5d   :  { %599 = vmatpush1.bf16.msra.mxu0 %v1171_v38 }
  0x5e   :  { %600 = vmatprep.subr.bf16.mxu0 %v1176_v40 }
  0x5f   :  { %1053 = vmatpush3.bf16.msra.mxu1 %v1179_v41 }
  0x60   :  { %1054 = vmatprep.subr.bf16.mxu1 %v1335_v39 }
  0x61   :  { %601 = vmatpush1.bf16.msra.mxu0 %v1178_v42 }
  0x62   :  { %602 = vmatprep.subr.bf16.mxu0 %v1180_v43 }
  0x63   :  { %1055 = vmatpush3.bf16.msra.mxu1 %v1183_v44 }
  0x64   :  { %1056 = vmatprep.subr.bf16.mxu1 %v1335_v39 }
  0x65   :  { %603 = vmatpush1.bf16.msra.mxu0 %v1182_v45 }
  0x66   :  { %604 = vmatprep.subr.bf16.mxu0 %v1184_v46 }
  0x67   :  { %1057 = vmatpush3.bf16.msra.mxu1 %v1187_v47 }
  0x68   :  { %1058 = vmatprep.subr.bf16.mxu1 %v1335_v39 }
  0x69   :  { %605 = vmatpush1.bf16.msra.mxu0 %v1186_v48 }
  0x6a   :  { %606 = vmatprep.subr.bf16.mxu0 %v1188_v49 }
  0x6b   :  { %1059 = vmatpush3.bf16.msra.mxu1 %v1191_v50 }
  0x6c   :  { %1060 = vmatprep.subr.bf16.mxu1 %v1335_v39 }
  0x6d   :  { %607 = vmatpush1.bf16.msra.mxu0 %v1190_v51 }
  0x6e   :  { %608 = vmatprep.subr.bf16.mxu0 %v1192_v52 }
  0x6f   :  { %1061 = vmatpush3.bf16.msra.mxu1 %v1195_v53 }
  0x70   :  { %1062 = vmatprep.subr.bf16.mxu1 %v1335_v39 }
  0x71   :  { %609 = vmatpush1.bf16.msra.mxu0 %v1194_v54 }
  0x72   :  { %610 = vmatprep.subr.bf16.mxu0 %v1196_v55 }
  0x73   :  { %1063 = vmatpush3.bf16.msra.mxu1 %v1199_v57  ;;  %v1226_v57 = vld [vmem:[#allocation7] sm:$0xff]  }
  0x74   :  { %1064 = vmatprep.subr.bf16.mxu1 %v1335_v39 }
  0x75   :  { %611 = vmatpush1.bf16.msra.mxu0 %v1198_v56 }
  0x76   :  { %623 = vmatprep.subr.bf16.mxu0 %v1202_v58 }
  0x77   :  { %1065 = vmatpush3.bf16.msra.mxu1 %v1203_v59 }
  0x78   :  { %613 = vmatmul.mubr.bf16.vlgmr.msra.gmra.mrb[0].mxu0 %v1172_v36  ;;  %1070 = vmatprep.subr.bf16.mxu1 %v1335_v39 }
  0x79   :  { %624 = vmatpush1.bf16.msra.mxu0 %v1200_v60  ;;  %655 = vmatprep.mubr.bf16.mxu0 %v1337_v0  ;;  %v1227_v60 = vld [vmem:[#allocation7 + $0x8] sm:$0xff]   ;;  %v1228_v0 = vld [vmem:[#allocation7 + $0x10] sm:$0xff]  }
  0x7a   :  { %625 = vmatprep.subr.bf16.mxu0 %v1206_v61  ;;  %1067 = vmatmul.mubr.bf16.vlgmr.msra.gmra.mrb[4].mxu1 %v1207_v62 }
  0x7b   :  { %1086 = vmatprep.mubr.msk.bf16.mxu1 %vm1336_vm0, %v1335_v39  ;;  %1071 = vmatpush3.bf16.msra.mxu1 %v1226_v57 }
  0x7c   :  { %1072 = vmatprep.subr.bf16.mxu1 %v1335_v39 }
  0x7d   :  { %626 = vmatpush1.bf16.msra.mxu0 %v1204_v63 }
  0x7e   :  { %627 = vmatprep.subr.bf16.mxu0 %v1210_v1  ;;  %v1229_v1 = vld [vmem:[#allocation7 + $0x18] sm:$0xff]  }
  0x7f   :  { %1073 = vmatpush3.bf16.msra.mxu1 %v1227_v60 }
  0x80   :  { %1074 = vmatprep.subr.bf16.mxu1 %v1335_v39 }
  0x81   :  { %628 = vmatpush1.bf16.msra.mxu0 %v1208_v2  ;;  %v1230_v2 = vld [vmem:[#allocation7 + $0x20] sm:$0xff]  }
  0x82   :  { %629 = vmatprep.subr.bf16.mxu0 %v1213_v3  ;;  %v1231_v3 = vld [vmem:[#allocation7 + $0x28] sm:$0xff]  }
  0x83   :  { %1075 = vmatpush3.bf16.msra.mxu1 %v1228_v0 }
  0x84   :  { %1076 = vmatprep.subr.bf16.mxu1 %v1335_v39 }
  0x85   :  { %630 = vmatpush1.bf16.msra.mxu0 %v1211_v4  ;;  %v1232_v4 = vld [vmem:[#allocation7 + $0x30] sm:$0xff]  }
  0x86   :  { %631 = vmatprep.subr.bf16.mxu0 %v1216_v5  ;;  %v1233_v5 = vld [vmem:[#allocation7 + $0x38] sm:$0xff]  }
  0x87   :  { %1077 = vmatpush3.bf16.msra.mxu1 %v1229_v1 }
  0x88   :  { %1078 = vmatprep.subr.bf16.mxu1 %v1335_v39 }
  0x89   :  { %632 = vmatpush1.bf16.msra.mxu0 %v1214_v6 }
  0x8a   :  { %633 = vmatprep.subr.bf16.mxu0 %v1219_v7 }
  0x8b   :  { %1079 = vmatpush3.bf16.msra.mxu1 %v1230_v2 }
  0x8c   :  { %1080 = vmatprep.subr.bf16.mxu1 %v1335_v39 }
  0x8d   :  { %634 = vmatpush1.bf16.msra.mxu0 %v1217_v8 }
  0x8e   :  { %635 = vmatprep.subr.bf16.mxu0 %v1222_v9 }
  0x8f   :  { %1081 = vmatpush3.bf16.msra.mxu1 %v1231_v3 }
  0x90   :  { %1082 = vmatprep.subr.bf16.mxu1 %v1335_v39 }
  0x91   :  { %636 = vmatpush1.bf16.msra.mxu0 %v1220_v10 }
  0x92   :  { %637 = vmatprep.subr.bf16.mxu0 %v1225_v11 }
  0x93   :  { %1083 = vmatpush3.bf16.msra.mxu1 %v1232_v4 }
  0x94   :  { %1084 = vmatprep.subr.bf16.mxu1 %v1335_v39  ;;  %v992_v39 = vld [vmem:[%s1463_s4] ss:$0 sm:$0xff] }
  0x95   :  { %638 = vmatpush1.bf16.msra.mxu0 %v1223_v12 }
  0x97   :  { %1085 = vmatpush3.bf16.msra.mxu1 %v1233_v5 }
  0x98   :  { %656 = vmatmul.mubr.bf16.vlgmr.msra.gmra.mrb[0].mxu0 %v1207_v62 }
 0x12d   :  { %v1026_v13 = vpop.f32.mrb[0].mxu1 }
 0x12e   :  { %v1027_v14 = vpop.f32.mrb[1].mxu1 }
 0x12f   :  { %v1028_v15 = vadd.f32 %v1027_v14, %v1026_v13  ;;  %v1029_v16 = vpop.f32.mrb[2].mxu1 }
 0x130   :  { %v1030_v17 = vpop.f32.mrb[3].mxu1 }
 0x131   :  { %v1031_v18 = vadd.f32 %v1030_v17, %v1029_v16  ;;  %v701_v24 = vadd.f32 %v1028_v15, %v176_v23 }
 0x133   :  { %v704_v25 = vadd.f32 %v1031_v18, %v176_v23 }
 0x14d   :  { %v741_v26 = vpop.f32.mrb[4].mxu1 }
 0x14e   :  { %v742_v27 = vadd.f32 %v741_v26, %v701_v24  ;;  %v1068_v28 = vpop.f32.mrb[5].mxu1 }
 0x14f   :  { %v744_v29 = vpop.f32.mrb[6].mxu1 }
 0x150   :  { %v745_v30 = vadd.f32 %v744_v29, %v704_v25  ;;  %v1069_v31 = vpop.f32.mrb[7].mxu1  ;;  %v750_v48 = vmax.f32 %v742_v27, 0.0 }
 0x152   :  { %v753_v51 = vmax.f32 %v745_v30, 0.0 }
 0x16b   :  { %v657_v36 = vpop.f32.mrb[0].mxu0 }
 0x16c   :  { %v1090_v37 = vadd.f32 %v657_v36, %v168_v34  ;;  %v659_v38 = vpop.f32.mrb[1].mxu0 }
 0x16d   :  { %v1091_v40 = vadd.f32 %v659_v38, %v172_v35  ;;  %v661_v41 = vpop.f32.mrb[2].mxu0 }
 0x16e   :  { %v748_v42 = vmax.f32 %v1090_v37, 0.0  ;;  %v1092_v43 = vadd.f32 %v661_v41, %v168_v34  ;;  %v663_v44 = vpop.f32.mrb[3].mxu0 }
 0x16f   :  { %v749_v45 = vmax.f32 %v1091_v40, 0.0  ;;  %v1093_v46 = vadd.f32 %v663_v44, %v172_v35 }
 0x170   :  { %v751_v47 = vmax.f32 %v1092_v43, 0.0 }
 0x171   :  { %v754_v49 = vmax.f32 %v748_v42, %v749_v45  ;;  %v752_v50 = vmax.f32 %v1093_v46, 0.0 }
 0x173   :  { %v755_v52 = vmax.f32 %v751_v47, %v752_v50  ;;  %v756_v53 = vmax.f32 %v754_v49, %v750_v48 }
 0x175   :  { %v757_v54 = vmax.f32 %v755_v52, %v753_v51 }
 0x177   :  { %v1111_v55 = vpack.i.bf16 %v757_v54, %v756_v53 }
 0x179   :  { %1112 = vrot.lane.b32.xlu0 %v1111_v55, %s1333_s0 }
 0x1eb   :  { %v1113_v56 = vpop.permute.xlu0 %1112 }
 0x1ec   :  { %v1115_v58 = vunpack.i.h.bf16 %v1113_v56  ;;  %v1114_v59 = vunpack.i.l.bf16 %v1113_v56 }
 0x1ee   :  { %v763_v61 = vmax.f32 %v757_v54, %v1115_v58  ;;  %v762_v62 = vmax.f32 %v756_v53, %v1114_v59 }
 0x1f0   :  { %v1116_v63 = vpack.i.bf16 %v763_v61, %v762_v62 }
 0x1f2   :  { %1117 = vrot.lane.b32.xlu0 %v1116_v63, %s1338_s2 }
 0x264   :  { %v1118_v6 = vpop.permute.xlu0 %1117 }
 0x265   :  { %v1120_v7 = vunpack.i.h.bf16 %v1118_v6  ;;  %v1119_v8 = vunpack.i.l.bf16 %v1118_v6 }
 0x267   :  { %v769_v9 = vmax.f32 %v763_v61, %v1120_v7  ;;  %v768_v10 = vmax.f32 %v762_v62, %v1119_v8 }
 0x269   :  { %v1121_v11 = vpack.i.bf16 %v769_v9, %v768_v10 }
 0x26b   :  { %1122 = vrot.lane.b32.xlu1 %v1121_v11, %s1339_s7 }
 0x2dd   :  { %v1123_v12 = vpop.permute.xlu1 %1122 }
 0x2de   :  { %v1125_v13 = vunpack.i.h.bf16 %v1123_v12  ;;  %v1124_v14 = vunpack.i.l.bf16 %v1123_v12 }
 0x2e0   :  { %v775_v15 = vmax.f32 %v769_v9, %v1125_v13  ;;  %v774_v16 = vmax.f32 %v768_v10, %v1124_v14 }
 0x2e2   :  { %v776_v17 = vpack.c.bf16 %v775_v15, %v774_v16 }
 0x2e4   :  { %1087 = vmatmul.mubr.bf16.vlgmr.msra.gmra.mrb[8].mxu1 %v776_v17 }
 0x3b7   :  { %v882_v18 = vpop.f32.mrb[8].mxu1 }
 0x3b8   :  { %v1088_v19 = vpop.f32.mrb[9].mxu1  ;;  %v883_v21 = vadd.f32 %v992_v39, %v882_v18 }
 0x3b9   :  { %v885_v20 = vpop.f32.mrb[10].mxu1 }
 0x3ba   :  { %v886_v22 = vadd.f32 %v992_v39, %v885_v20  ;;  %v1089_v23 = vpop.f32.mrb[11].mxu1 }
 0x3bc   :  { %v1008_v24 = vpack.c.bf16 %v886_v22, %v883_v21 }
 0x3be   :  { %1009 = vst [vmem:[#allocation8] sm:$0xff] %v1008_v24  }
 0x3bf   :  { %1311 = shalt.err (!%p1308_p0)
}
 0x3c0   :  { %s1312_s14 = scalar_lea.hbm %s1464_s5, 128 }
 0x3c1   :  { %p1313_p1 = scmp.ne.s32.totalorder %s1464_s5, %s1312_s14  ;;  %p1316_p2 = scmp.lt.u32.totalorder %s1312_s14, %s1464_s5 }
 0x3c3   :  { %p1318_p3 = pnand %p1316_p2, %p1313_p1 }
 0x3c5   :  { %1321 = shalt.err (!%p1318_p3)
}
 0x3c6   :  { %910 = dma.vmem_to_hbm [thread:$0]  %s905_s11, 128, %s1464_s5, [#allocation4], %s1333_s0, %s1333_s0, %s1334_s21  }
 0x3c7   :  { %1326 = dma.done.wait [#allocation4], 128  }
 0x3c8   :  { %1327 = vsyncadd [#allocation4], 4294967168 }
 0x3c9   :  { %914 = vsyncpa [#allocation3], 1 }
 0x3ca   :  { %915 = vsyncpa [#allocation6], 1 }
 0x3cb   :  { %916 = vsyncpa [#allocation4], 1 }

</bundles_post_ra>
